<compile_context>
chip_gen: v7x
topology: tpu7x:2x2x1
jax: 0.10.0
libtpu: 0.0.40
codegen_flags: <defaults>
</compile_context>

<pallas_src>
import functools
import math

import jax
import jax.numpy as jnp
from jax import lax
from jax.experimental import pallas as pl
from jax.experimental.pallas import tpu as pltpu


def _round_up(x, m):
    return ((x + m - 1) // m) * m


def _vmem_capacity_bytes():
    try:
        return int(pltpu.get_tpu_info().vmem_capacity_bytes)
    except Exception:
        return 64 * 1024 * 1024  # conservative fallback: v7x per-TC VMEM


def _vmem_estimate_bytes(tn, f, m, dq, cbytes):
    f32 = 4
    return int(
        3 * tn * f * cbytes              # feats tiles (multi-buffered)
        + 2 * f * (dq + f) * cbytes      # resident fused [Wq|Wv] (2x in case double-buffered)
        + (dq + f) * f32                 # fused bias
        + 2 * m * dq * cbytes            # resident q_key
        + 2 * m * f * f32                # output fusion block (+ writeback buffer)
        + 2 * m * f32                    # running max / sum scratch
        + tn * (dq + f) * f32            # qv f32 intermediate
        + tn * (dq + f) * cbytes         # low-precision copies of q_tile / v_tile
        + 2 * m * tn * f32               # s / p temporaries
    )


# ---------------------------------------------------------------------------
# Default path kernel: online softmax over N + fusion accumulation.
# ---------------------------------------------------------------------------
def _fusion_kernel(n_actual, dq, scale, needs_mask, compute_dtype,
                   feats_ref, qkey_ref, wqv_ref, bqv_ref,
                   fusion_ref, m_sc, l_sc):
    i = pl.program_id(0)
    tn = feats_ref.shape[0]

    @pl.when(i == 0)
    def _init():
        m_sc[...] = jnp.full_like(m_sc, -jnp.inf)
        l_sc[...] = jnp.zeros_like(l_sc)
        fusion_ref[...] = jnp.zeros_like(fusion_ref)

    # One fused MXU pass over the feats tile: [Q | V] = feats @ [Wq | Wv] + [bq | bv].
    qv = jnp.dot(feats_ref[...], wqv_ref[...],
                 preferred_element_type=jnp.float32) + bqv_ref[...]        # (tN, dq+F)
    q_t = qv[:, :dq].astype(compute_dtype)                                 # (tN, dq)
    v_t = qv[:, dq:].astype(compute_dtype)                                 # (tN, F)

    # Transposed logits (M, tN): N sits on the lane axis -> no explicit transpose,
    # lane-axis softmax reduce, fusion = P @ V directly.
    s = lax.dot_general(qkey_ref[...], q_t,
                        dimension_numbers=(((1,), (1,)), ((), ())),
                        preferred_element_type=jnp.float32) * scale        # (M, tN)

    if needs_mask:
        # Only the last tile can contain padded columns; skip the mask elsewhere.
        def _mask(x):
            col = i * tn + lax.broadcasted_iota(jnp.int32, (1, tn), 1)
            return jnp.where(col < n_actual, x, -jnp.inf)

        s = lax.cond(i == pl.num_programs(0) - 1, _mask, lambda x: x, s)

    # Online (flash-style) softmax over the tiled N axis, accumulating straight
    # into the VMEM-resident output block (constant out index_map).
    m_prev = m_sc[...]
    m_new = jnp.maximum(m_prev, jnp.max(s, axis=-1, keepdims=True))        # (M, 1)
    alpha = jnp.exp(m_prev - m_new)
    p = jnp.exp(s - m_new)                                                 # (M, tN)
    l_sc[...] = alpha * l_sc[...] + jnp.sum(p, axis=-1, keepdims=True)
    fusion_ref[...] = alpha * fusion_ref[...] + jnp.dot(
        p.astype(compute_dtype), v_t, preferred_element_type=jnp.float32)  # (M, F)
    m_sc[...] = m_new

    @pl.when(i == pl.num_programs(0) - 1)
    def _finalize():
        # Exact normalization (runs once; approx reciprocal buys nothing here).
        fusion_ref[...] = fusion_ref[...] / l_sc[...]


# ---------------------------------------------------------------------------
# attention_only path kernel: raw (unscaled, pre-softmax) logits, lane-dense (M, N).
# ---------------------------------------------------------------------------
def _attn_kernel(compute_dtype, feats_ref, qkey_ref, wq_ref, bq_ref, attn_ref):
    q_t = (jnp.dot(feats_ref[...], wq_ref[...],
                   preferred_element_type=jnp.float32)
           + bq_ref[...]).astype(compute_dtype)                            # (tN, 128)
    attn_ref[...] = lax.dot_general(qkey_ref[...], q_t,
                                    dimension_numbers=(((1,), (1,)), ((), ())),
                                    preferred_element_type=jnp.float32)    # (M, tN)


# ---------------------------------------------------------------------------
# Wrappers
# ---------------------------------------------------------------------------
def nonlocal_ranking(feats, key_feat, wq, bq, wv, bv,
                     attention_only=False, block_n=None,
                     compute_dtype=jnp.bfloat16):
    """Pallas-backed NonLocalRanking.forward (top_k=None path).

    feats: (N, F), key_feat: (M, F), wq: (F, 128), bq: (128,), wv: (F, F), bv: (F,).
    Returns (feats, fusion_feature) or the raw (N, M) attention if attention_only.
    """
    N, F = feats.shape
    M = key_feat.shape[0]
    Dq = wq.shape[1]
    cbytes = jnp.dtype(compute_dtype).itemsize

    cap = _vmem_capacity_bytes()
    budget = int(0.80 * cap)                  # headroom for compiler-internal scratch
    if block_n is None:
        block_n = 1024 if cap >= (100 << 20) else 512   # v5e/v6e: 128 MiB; v7x: 64 MiB
    assert block_n % 128 == 0

    tn = min(block_n, _round_up(N, 128))
    while tn > 128 and _vmem_estimate_bytes(tn, F, M, Dq, cbytes) > budget:
        tn = max(128, _round_up(tn // 2, 128))
    n_pad = _round_up(N, tn)
    grid_n = n_pad // tn
    needs_mask = n_pad != N

    vmem_limit = int(min(budget,
                         max(24 << 20,
                             2 * _vmem_estimate_bytes(tn, F, M, Dq, cbytes))))

    feats_c = feats.astype(jnp.float32).astype(compute_dtype)
    if needs_mask:
        feats_c = jnp.pad(feats_c, ((0, n_pad - N), (0, 0)))

    # Tiny (M,F)@(F,128) matmul: precompute q_key in f32 in the wrapper and pass it
    # as a resident (M, 128) input (no per-tile recompute, no qk scratch).
    q_key = (key_feat.astype(jnp.float32) @ wq.astype(jnp.float32)
             + bq.astype(jnp.float32)).astype(compute_dtype)

    if attention_only:
        attn = pl.pallas_call(
            functools.partial(_attn_kernel, compute_dtype),
            out_shape=jax.ShapeDtypeStruct((M, n_pad), jnp.float32),
            grid_spec=pltpu.PrefetchScalarGridSpec(
                num_scalar_prefetch=0,
                grid=(grid_n,),
                in_specs=[
                    pl.BlockSpec((tn, F), lambda i: (i, 0)),    # feats tile (pipelined)
                    pl.BlockSpec((M, Dq), lambda i: (0, 0)),    # q_key (resident)
                    pl.BlockSpec((F, Dq), lambda i: (0, 0)),    # Wq (resident)
                    pl.BlockSpec((1, Dq), lambda i: (0, 0)),    # bq (resident)
                ],
                out_specs=pl.BlockSpec((M, tn), lambda i: (0, i)),
            ),
            compiler_params=pltpu.CompilerParams(
                dimension_semantics=("parallel",),
                vmem_limit_bytes=vmem_limit),
        )(feats_c, q_key,
          wq.astype(compute_dtype),
          bq.astype(jnp.float32).reshape(1, Dq))
        # Torch returns A = Q @ q_key.T with shape (N, M) (unscaled, pre-softmax).
        # TODO(synk): a downstream top-k over N could consume the lane-dense (M, N)
        # slab directly and skip this transpose.
        return attn[:, :N].T

    # Fused RHS [Wq | Wv] so the feats tile streams through the MXU exactly once.
    w_qv = jnp.concatenate([wq, wv], axis=1).astype(compute_dtype)          # (F, Dq+F)
    b_qv = jnp.concatenate([bq, bv]).astype(jnp.float32).reshape(1, Dq + F)

    scale = 1.0 / math.sqrt(float(Dq))
    kernel = functools.partial(_fusion_kernel, N, Dq, scale, needs_mask, compute_dtype)
    fusion = pl.pallas_call(
        kernel,
        out_shape=jax.ShapeDtypeStruct((M, F), jnp.float32),
        grid_spec=pltpu.PrefetchScalarGridSpec(
            num_scalar_prefetch=0,
            grid=(grid_n,),
            in_specs=[
                pl.BlockSpec((tn, F), lambda i: (i, 0)),        # feats tile (pipelined)
                pl.BlockSpec((M, Dq), lambda i: (0, 0)),        # q_key (resident)
                pl.BlockSpec((F, Dq + F), lambda i: (0, 0)),    # [Wq|Wv] (resident)
                pl.BlockSpec((1, Dq + F), lambda i: (0, 0)),    # [bq|bv] (resident)
            ],
            out_specs=pl.BlockSpec((M, F), lambda i: (0, 0)),   # VMEM-resident accumulator
            scratch_shapes=[
                pltpu.VMEM((M, 1), jnp.float32),    # running max
                pltpu.VMEM((M, 1), jnp.float32),    # running sum
            ],
        ),
        compiler_params=pltpu.CompilerParams(
            dimension_semantics=("arbitrary",),      # N is a softmax reduction axis
            vmem_limit_bytes=vmem_limit),
    )(feats_c, q_key, w_qv, b_qv)

    return feats, fusion


def adaptive_selection(cluster_features, key_feats, wq, bq, wv, bv,
                       num_sample_feature=1024, selecting="all",
                       compute_dtype=jnp.bfloat16):
    """AdaptiveSelection.forward, selecting='all' path, on top of the Pallas kernel.

    TODO(synk): selecting='adaptive' (torch.topk + index_select) and
    'cluster_random' (randperm subsampling) are data-dependent selections not
    implemented here; only selecting='all' is supported.
    """
    assert selecting == "all", "only selecting='all' is implemented"
    sel_list, fusion_list = [], []
    for feats, key_feat in zip(cluster_features, key_feats):
        sel, fusion = nonlocal_ranking(feats, key_feat, wq, bq, wv, bv,
                                       compute_dtype=compute_dtype)
        sel_list.append(sel)
        fusion_list.append(fusion)
    selected = jnp.concatenate(sel_list, axis=0)
    cluster_fusion = jnp.concatenate(fusion_list, axis=0)
    n = selected.shape[0]
    if n < num_sample_feature:
        selected = jnp.pad(selected, ((0, num_sample_feature - n), (0, 0)))
    else:
        selected = selected[:num_sample_feature]
    return selected, cluster_fusion


# ---------------------------------------------------------------------------
# Pure-JAX references
# ---------------------------------------------------------------------------
def _reference_fusion(feats, key_feat, wq, bq, wv, bv):
    q = feats @ wq + bq
    q_key = key_feat @ wq + bq
    a = q @ q_key.T
    a = jax.nn.softmax(a / jnp.sqrt(jnp.float32(q.shape[1])), axis=0)
    v = feats @ wv + bv
    return a.T @ v


def _reference_attn(feats, key_feat, wq, bq):
    return (feats @ wq + bq) @ (key_feat @ wq + bq).T


if __name__ == "__main__":
    key = jax.random.PRNGKey(0)
    k1, k2, k3, k4, k5, k6, k7, k8 = jax.random.split(key, 8)

    # ---- small single-cluster check (one grid step) ------------------------
    N, M, F = 8, 2, 32
    feats = jax.random.normal(k1, (N, F), dtype=jnp.float32)
    key_feat = jax.random.normal(k2, (M, F), dtype=jnp.float32)
    wq = jax.random.normal(k3, (F, 128), dtype=jnp.float32) / jnp.sqrt(jnp.float32(F))
    bq = jax.random.normal(k4, (128,), dtype=jnp.float32) * 0.01
    wv = jax.random.normal(k5, (F, F), dtype=jnp.float32) / jnp.sqrt(jnp.float32(F))
    bv = jax.random.normal(k6, (F,), dtype=jnp.float32) * 0.01

    ref = _reference_fusion(feats, key_feat, wq, bq, wv, bv)
    attn_ref = _reference_attn(feats, key_feat, wq, bq)

    # f32 compute path: tight agreement with the torch-equivalent reference.
    _, fusion32 = nonlocal_ranking(feats, key_feat, wq, bq, wv, bv,
                                   compute_dtype=jnp.float32)
    jax.block_until_ready(fusion32)
    assert fusion32.shape == (M, F)
    assert jnp.allclose(fusion32, ref, atol=2e-3, rtol=2e-3), "f32 fusion mismatch"

    # bf16 MXU path (default): looser tolerance from bf16 input rounding.
    feats_out, fusion16 = nonlocal_ranking(feats, key_feat, wq, bq, wv, bv)
    jax.block_until_ready(fusion16)
    assert feats_out.shape == (N, F)
    assert jnp.allclose(fusion16, ref, atol=5e-2, rtol=5e-2), "bf16 fusion mismatch"

    attn32 = nonlocal_ranking(feats, key_feat, wq, bq, wv, bv,
                              attention_only=True, compute_dtype=jnp.float32)
    jax.block_until_ready(attn32)
    assert attn32.shape == (N, M)
    assert jnp.allclose(attn32, attn_ref, atol=2e-3, rtol=2e-3), "f32 attn mismatch"

    attn16 = nonlocal_ranking(feats, key_feat, wq, bq, wv, bv, attention_only=True)
    jax.block_until_ready(attn16)
    assert jnp.allclose(attn16, attn_ref, atol=3e-1, rtol=5e-2), "bf16 attn mismatch"

    # ---- multi-tile check: exercises online softmax + gated padding mask ---
    N2, M2, F2 = 300, 4, 64
    feats2 = jax.random.normal(k7, (N2, F2), dtype=jnp.float32)
    key2 = jax.random.normal(k8, (M2, F2), dtype=jnp.float32)
    wq2 = jax.random.normal(k3, (F2, 128), dtype=jnp.float32) / jnp.sqrt(jnp.float32(F2))
    bq2 = jax.random.normal(k4, (128,), dtype=jnp.float32) * 0.01
    wv2 = jax.random.normal(k5, (F2, F2), dtype=jnp.float32) / jnp.sqrt(jnp.float32(F2))
    bv2 = jax.random.normal(k6, (F2,), dtype=jnp.float32) * 0.01
    ref2 = _reference_fusion(feats2, key2, wq2, bq2, wv2, bv2)

    _, fusion2_32 = nonlocal_ranking(feats2, key2, wq2, bq2, wv2, bv2,
                                     block_n=128, compute_dtype=jnp.float32)
    jax.block_until_ready(fusion2_32)
    assert jnp.allclose(fusion2_32, ref2, atol=2e-3, rtol=2e-3), "f32 multi-tile mismatch"

    _, fusion2_16 = nonlocal_ranking(feats2, key2, wq2, bq2, wv2, bv2, block_n=128)
    jax.block_until_ready(fusion2_16)
    assert jnp.allclose(fusion2_16, ref2, atol=5e-2, rtol=5e-2), "bf16 multi-tile mismatch"

    # ---- AdaptiveSelection (selecting='all') over two clusters -------------
    c2 = jax.random.normal(k7, (12, F), dtype=jnp.float32)
    kf2 = jax.random.normal(k8, (3, F), dtype=jnp.float32)
    selected, cluster_fusion = adaptive_selection(
        [feats, c2], [key_feat, kf2], wq, bq, wv, bv,
        num_sample_feature=32, selecting="all")
    jax.block_until_ready(cluster_fusion)
    assert selected.shape == (32, F)
    assert cluster_fusion.shape == (M + 3, F)

    print("KERNEL_OK")
</pallas_src>

<mosaic_0001>
module attributes {stable_mosaic.version = 11 : i64} {
  func.func @_fusion_kernel(%arg0: i32, %arg1: memref<128x32xf32, #tpu.memory_space<vmem>>, %arg2: memref<2x128xf32, #tpu.memory_space<vmem>>, %arg3: memref<32x160xf32, #tpu.memory_space<vmem>>, %arg4: memref<1x160xf32, #tpu.memory_space<vmem>>, %arg5: memref<2x32xf32, #tpu.memory_space<vmem>>, %arg6: memref<2x1xf32, #tpu.memory_space<vmem>>, %arg7: memref<2x1xf32, #tpu.memory_space<vmem>>) attributes {dimension_semantics = [#tpu.dimension_semantics<arbitrary>], iteration_bounds = array<i64: 1>, scalar_prefetch = 0 : i64, scratch_operands = 2 : i64, tpu.core_type = #tpu.core_type<tc>, window_params = [{transform_indices = @transform_0, window_bounds = array<i64: 128, 32>}, {pipeline_mode = #tpu.pipeline_mode<synchronous>, transform_indices = @transform_1, window_bounds = array<i64: 2, 128>}, {pipeline_mode = #tpu.pipeline_mode<synchronous>, transform_indices = @transform_2, window_bounds = array<i64: 32, 160>}, {pipeline_mode = #tpu.pipeline_mode<synchronous>, transform_indices = @transform_3, window_bounds = array<i64: 1, 160>}, {pipeline_mode = #tpu.pipeline_mode<synchronous>, transform_indices = @transform_4, window_bounds = array<i64: 2, 32>}]} {
    %c0_i32 = arith.constant 0 : i32
    %0 = arith.cmpi eq, %arg0, %c0_i32 : i32
    %1 = arith.extui %0 : i1 to i32
    %c0_i32_0 = arith.constant 0 : i32
    %2 = arith.cmpi ne, %1, %c0_i32_0 : i32
    scf.if %2 {
      %cst_29 = arith.constant 0xFF800000 : f32
      %44 = vector.broadcast %cst_29 : f32 to vector<2x1xf32>
      %c0_30 = arith.constant 0 : index
      %c0_31 = arith.constant 0 : index
      %45 = vector.load %arg6[%c0_30, %c0_31] : memref<2x1xf32, #tpu.memory_space<vmem>>, vector<2x1xf32>
      tpu.vector_store %arg6[%c0_30, %c0_31], %44 {strides = array<i32>} : memref<2x1xf32, #tpu.memory_space<vmem>>, vector<2x1xf32>,
      %cst_32 = arith.constant 0.000000e+00 : f32
      %46 = vector.broadcast %cst_32 : f32 to vector<2x1xf32>
      %c0_33 = arith.constant 0 : index
      %c0_34 = arith.constant 0 : index
      %47 = vector.load %arg7[%c0_33, %c0_34] : memref<2x1xf32, #tpu.memory_space<vmem>>, vector<2x1xf32>
      tpu.vector_store %arg7[%c0_33, %c0_34], %46 {strides = array<i32>} : memref<2x1xf32, #tpu.memory_space<vmem>>, vector<2x1xf32>,
      %cst_35 = arith.constant 0.000000e+00 : f32
      %48 = vector.broadcast %cst_35 : f32 to vector<2x32xf32>
      %c0_36 = arith.constant 0 : index
      %c0_37 = arith.constant 0 : index
      %49 = vector.load %arg5[%c0_36, %c0_37] : memref<2x32xf32, #tpu.memory_space<vmem>>, vector<2x32xf32>
      tpu.vector_store %arg5[%c0_36, %c0_37], %48 {strides = array<i32>} : memref<2x32xf32, #tpu.memory_space<vmem>>, vector<2x32xf32>,
    } else {
    }
    %c0 = arith.constant 0 : index
    %c0_1 = arith.constant 0 : index
    %3 = vector.load %arg1[%c0, %c0_1] : memref<128x32xf32, #tpu.memory_space<vmem>>, vector<128x32xf32>
    %c0_2 = arith.constant 0 : index
    %c0_3 = arith.constant 0 : index
    %4 = vector.load %arg3[%c0_2, %c0_3] : memref<32x160xf32, #tpu.memory_space<vmem>>, vector<32x160xf32>
    %cst = arith.constant dense<0.000000e+00> : vector<128x160xf32>
    %5 = tpu.matmul %3, %4, %cst {dimension_numbers = #tpu.dot_dimension_numbers<[1], [0], [0], [1], [0, 0, 1, 1], [], []>} : vector<128x32xf32>, vector<32x160xf32>, vector<128x160xf32> -> vector<128x160xf32>
    %c0_4 = arith.constant 0 : index
    %c0_5 = arith.constant 0 : index
    %6 = vector.load %arg4[%c0_4, %c0_5] : memref<1x160xf32, #tpu.memory_space<vmem>>, vector<1x160xf32>
    %7 = vector.broadcast %6 : vector<1x160xf32> to vector<128x160xf32>
    %8 = arith.addf %5, %7 : vector<128x160xf32>
    %9 = vector.extract_strided_slice %8 {offsets = [0, 0], sizes = [128, 128], strides = [1, 1]} : vector<128x160xf32> to vector<128x128xf32>
    %10 = vector.extract_strided_slice %8 {offsets = [0, 128], sizes = [128, 32], strides = [1, 1]} : vector<128x160xf32> to vector<128x32xf32>
    %c0_6 = arith.constant 0 : index
    %c0_7 = arith.constant 0 : index
    %11 = vector.load %arg2[%c0_6, %c0_7] : memref<2x128xf32, #tpu.memory_space<vmem>>, vector<2x128xf32>
    %cst_8 = arith.constant dense<0.000000e+00> : vector<2x128xf32>
    %12 = tpu.matmul %11, %9, %cst_8 {dimension_numbers = #tpu.dot_dimension_numbers<[1], [1], [0], [0], [0, 0, 1, 0], [], []>} : vector<2x128xf32>, vector<128x128xf32>, vector<2x128xf32> -> vector<2x128xf32>
    %cst_9 = arith.constant 0.0883883461 : f32
    %13 = vector.broadcast %cst_9 : f32 to vector<2x128xf32>
    %14 = arith.mulf %12, %13 : vector<2x128xf32>
    %c0_i32_10 = arith.constant 0 : i32
    %15 = arith.cmpi eq, %arg0, %c0_i32_10 : i32
    %16 = arith.extui %15 : i1 to i32
    %c0_i32_11 = arith.constant 0 : i32
    %17 = arith.cmpi ne, %16, %c0_i32_11 : i32
    %18 = scf.if %17 -> (vector<2x128xf32>) {
      %c128_i32 = arith.constant 128 : i32
      %44 = arith.muli %arg0, %c128_i32 : i32
      %45 = tpu.iota {dimensions = array<i32: 1>} : vector<1x128xi32>
      %46 = vector.broadcast %44 : i32 to vector<1x128xi32>
      %47 = arith.addi %46, %45 : vector<1x128xi32>
      %c8_i32 = arith.constant 8 : i32
      %48 = vector.broadcast %c8_i32 : i32 to vector<1x128xi32>
      %49 = arith.cmpi slt, %47, %48 : vector<1x128xi32>
      %cst_29 = arith.constant 0xFF800000 : f32
      %50 = vector.shape_cast %49 : vector<1x128xi1> to vector<1x128xi1>
      %51 = vector.broadcast %50 : vector<1x128xi1> to vector<2x128xi1>
      %52 = vector.broadcast %cst_29 : f32 to vector<2x128xf32>
      %53 = arith.select %51, %14, %52 : vector<2x128xi1>, vector<2x128xf32>
      scf.yield %53 : vector<2x128xf32>
    } else {
      scf.yield %14 : vector<2x128xf32>
    }
    %c0_12 = arith.constant 0 : index
    %c0_13 = arith.constant 0 : index
    %19 = vector.load %arg6[%c0_12, %c0_13] : memref<2x1xf32, #tpu.memory_space<vmem>>, vector<2x1xf32>
    %cst_14 = arith.constant dense<0xFF800000> : vector<2xf32>
    %20 = vector.multi_reduction <maximumf>, %18, %cst_14 [1] : vector<2x128xf32> to vector<2xf32>
    %21 = vector.shape_cast %20 : vector<2xf32> to vector<2x1xf32>
    %22 = arith.maximumf %19, %21 : vector<2x1xf32>
    %23 = arith.subf %19, %22 : vector<2x1xf32>
    %24 = math.exp %23 : vector<2x1xf32>
    %25 = vector.broadcast %22 : vector<2x1xf32> to vector<2x128xf32>
    %26 = arith.subf %18, %25 : vector<2x128xf32>
    %27 = math.exp %26 : vector<2x128xf32>
    %c0_15 = arith.constant 0 : index
    %c0_16 = arith.constant 0 : index
    %28 = vector.load %arg7[%c0_15, %c0_16] : memref<2x1xf32, #tpu.memory_space<vmem>>, vector<2x1xf32>
    %29 = arith.mulf %24, %28 : vector<2x1xf32>
    %cst_17 = arith.constant dense<0.000000e+00> : vector<2xf32>
    %30 = vector.multi_reduction <add>, %27, %cst_17 [1] : vector<2x128xf32> to vector<2xf32>
    %31 = vector.shape_cast %30 : vector<2xf32> to vector<2x1xf32>
    %32 = arith.addf %29, %31 : vector<2x1xf32>
    %c0_18 = arith.constant 0 : index
    %c0_19 = arith.constant 0 : index
    %33 = vector.load %arg7[%c0_18, %c0_19] : memref<2x1xf32, #tpu.memory_space<vmem>>, vector<2x1xf32>
    tpu.vector_store %arg7[%c0_18, %c0_19], %32 {strides = array<i32>} : memref<2x1xf32, #tpu.memory_space<vmem>>, vector<2x1xf32>,
    %c0_20 = arith.constant 0 : index
    %c0_21 = arith.constant 0 : index
    %34 = vector.load %arg5[%c0_20, %c0_21] : memref<2x32xf32, #tpu.memory_space<vmem>>, vector<2x32xf32>
    %35 = vector.broadcast %24 : vector<2x1xf32> to vector<2x32xf32>
    %36 = arith.mulf %35, %34 : vector<2x32xf32>
    %cst_22 = arith.constant dense<0.000000e+00> : vector<2x32xf32>
    %37 = tpu.matmul %27, %10, %cst_22 {dimension_numbers = #tpu.dot_dimension_numbers<[1], [0], [0], [1], [0, 0, 1, 1], [], []>} : vector<2x128xf32>, vector<128x32xf32>, vector<2x32xf32> -> vector<2x32xf32>
    %38 = arith.addf %36, %37 : vector<2x32xf32>
    %c0_23 = arith.constant 0 : index
    %c0_24 = arith.constant 0 : index
    %39 = vector.load %arg5[%c0_23, %c0_24] : memref<2x32xf32, #tpu.memory_space<vmem>>, vector<2x32xf32>
    tpu.vector_store %arg5[%c0_23, %c0_24], %38 {strides = array<i32>} : memref<2x32xf32, #tpu.memory_space<vmem>>, vector<2x32xf32>,
    %c0_25 = arith.constant 0 : index
    %c0_26 = arith.constant 0 : index
    %40 = vector.load %arg6[%c0_25, %c0_26] : memref<2x1xf32, #tpu.memory_space<vmem>>, vector<2x1xf32>
    tpu.vector_store %arg6[%c0_25, %c0_26], %22 {strides = array<i32>} : memref<2x1xf32, #tpu.memory_space<vmem>>, vector<2x1xf32>,
    %c0_i32_27 = arith.constant 0 : i32
    %41 = arith.cmpi eq, %arg0, %c0_i32_27 : i32
    %42 = arith.extui %41 : i1 to i32
    %c0_i32_28 = arith.constant 0 : i32
    %43 = arith.cmpi ne, %42, %c0_i32_28 : i32
    scf.if %43 {
      %c0_29 = arith.constant 0 : index
      %c0_30 = arith.constant 0 : index
      %44 = vector.load %arg5[%c0_29, %c0_30] : memref<2x32xf32, #tpu.memory_space<vmem>>, vector<2x32xf32>
      %c0_31 = arith.constant 0 : index
      %c0_32 = arith.constant 0 : index
      %45 = vector.load %arg7[%c0_31, %c0_32] : memref<2x1xf32, #tpu.memory_space<vmem>>, vector<2x1xf32>
      %46 = vector.broadcast %45 : vector<2x1xf32> to vector<2x32xf32>
      %47 = arith.divf %44, %46 : vector<2x32xf32>
      %c0_33 = arith.constant 0 : index
      %c0_34 = arith.constant 0 : index
      %48 = vector.load %arg5[%c0_33, %c0_34] : memref<2x32xf32, #tpu.memory_space<vmem>>, vector<2x32xf32>
      tpu.vector_store %arg5[%c0_33, %c0_34], %47 {strides = array<i32>} : memref<2x32xf32, #tpu.memory_space<vmem>>, vector<2x32xf32>,
    } else {
    }
    return
  }
  func.func @transform_0(%arg0: i32) -> (i32, i32) {
    %c0_i32 = arith.constant 0 : i32
    %c0_i32_0 = arith.constant 0 : i32
    return %arg0, %c0_i32 : i32, i32
  }
  func.func @transform_1(%arg0: i32) -> (i32, i32) {
    %c0_i32 = arith.constant 0 : i32
    %c0_i32_0 = arith.constant 0 : i32
    %c0_i32_1 = arith.constant 0 : i32
    return %c0_i32, %c0_i32_0 : i32, i32
  }
  func.func @transform_2(%arg0: i32) -> (i32, i32) {
    %c0_i32 = arith.constant 0 : i32
    %c0_i32_0 = arith.constant 0 : i32
    %c0_i32_1 = arith.constant 0 : i32
    return %c0_i32, %c0_i32_0 : i32, i32
  }
  func.func @transform_3(%arg0: i32) -> (i32, i32) {
    %c0_i32 = arith.constant 0 : i32
    %c0_i32_0 = arith.constant 0 : i32
    %c0_i32_1 = arith.constant 0 : i32
    return %c0_i32, %c0_i32_0 : i32, i32
  }
  func.func @transform_4(%arg0: i32) -> (i32, i32) {
    %c0_i32 = arith.constant 0 : i32
    %c0_i32_0 = arith.constant 0 : i32
    %c0_i32_1 = arith.constant 0 : i32
    return %c0_i32, %c0_i32_0 : i32, i32
  }
}

</mosaic_0001>

<bundles_post_ra>
// kernel: tpu_custom_call.1
= control target key start
LH: loop header
LB: loop body
LE: loop exit
PB: predicated region body
PF: predicated region fallthrough
CT: control target
= control target key end

     0   :  { %v709_v7 = vmov 0.0   ;;  %vm63_vm0 = vcmask 261120   ;;  %s929_s0 = inlined_call_operand.vmem [shape: f32[128,32], index: 0, kind: input, shape index: {}]   ;;  %s930_s1 = inlined_call_operand.vmem [shape: f32[2,128], index: 1, kind: input, shape index: {}]   ;;  %s931_s2 = inlined_call_operand.vmem [shape: f32[32,160], index: 2, kind: input, shape index: {}]   ;;  %s932_s3 = inlined_call_operand.vmem [shape: f32[1,160], index: 3, kind: input, shape index: {}]   ;;  %s933_s4 = inlined_call_operand.hbm [shape: f32[2,32], index: 4, kind: output, shape index: {}]  }
   0x1   :  { %v44_v0 = vld [vmem:[%s931_s2 + $0x8] sm:$0xff]  ;;  %v46_v1 = vld [vmem:[%s931_s2 + $0x18] sm:$0xff]  ;;  %v43_v2 = vld [vmem:[%s931_s2] sm:$0xff]  ;;  %176 = vmatprep.mubr.f32.mxu0 %v709_v7 }
   0x2   :  { %v615_v3 = vpack.c.bf16 %v46_v1, %v44_v0  ;;  %v45_v4 = vld [vmem:[%s931_s2 + $0x10] sm:$0xff]  ;;  %v48_v5 = vld [vmem:[%s931_s2 + $0x28] sm:$0xff]  ;;  %v50_v6 = vld [vmem:[%s931_s2 + $0x38] sm:$0xff] }
   0x3   :  { %v617_v8 = vpack.c.bf16 %v45_v4, %v43_v2  ;;  %v619_v9 = vpack.c.bf16 %v50_v6, %v48_v5  ;;  %v47_v10 = vld [vmem:[%s931_s2 + $0x20] sm:$0xff]  ;;  %v49_v11 = vld [vmem:[%s931_s2 + $0x30] sm:$0xff] }
   0x4   :  { %616 = vmatprep.subr.bf16.mxu0 %v615_v3  ;;  %v621_v12 = vpack.c.bf16 %v49_v11, %v47_v10  ;;  %v27_v13 = vld [vmem:[%s929_s0] sm:$0xff] }
   0x5   :  { %618 = vmatpush1.bf16.msra.mxu0 %v617_v8 }
   0x6   :  { %620 = vmatprep.subr.bf16.mxu0 %v619_v9 }
   0x9   :  { %622 = vmatpush1.bf16.msra.mxu0 %v621_v12 }
   0xa   :  { %9 = vsyncpa [#allocation5], 0  ;;  %v28_v14 = vld [vmem:[%s929_s0 + $0x8] sm:$0xff]  ;;  %v29_v15 = vld [vmem:[%s929_s0 + $0x10] sm:$0xff]  ;;  %v710_v29 = vmov 0.0|0.0   ;;  %vm711_vm1 = vmmov 0   ;;  %v53_v30 = vlaneseq }
   0xb   :  { %v30_v16 = vld [vmem:[%s929_s0 + $0x18] sm:$0xff]  ;;  %v31_v17 = vld [vmem:[%s929_s0 + $0x20] sm:$0xff]  ;;  %v32_v18 = vld [vmem:[%s929_s0 + $0x28] sm:$0xff]  ;;  %623 = vmatprep.subr.bf16.mxu1 %v710_v29  ;;  %647 = vmatprep.subr.bf16.mxu0 %v710_v29  ;;  %vm363_vm3 = vcmask 1041408   ;;  %vm22_vm4 = vcmask 1024   ;;  %vm25_vm5 = vcmask 254976  }
   0xc   :  { %495 = vmatmul.mubr.msk.f32.vlgmr.msra.gmra.mrb[0].mxu0 %vm63_vm0, %v27_v13  ;;  %v33_v19 = vld [vmem:[%s929_s0 + $0x30] sm:$0xff]  ;;  %v34_v20 = vld [vmem:[%s929_s0 + $0x38] sm:$0xff]  ;;  %v35_v21 = vld [vmem:[%s929_s0 + $0x40] sm:$0xff]  ;;  %577 = vmatprep.mubr.msk.f32.mxu1 %vm711_vm1, %v709_v7  ;;  %v54_v31 = vshrl.u32 %v53_v30, 7  ;;  %24 = vst.msk [vmem:[#allocation3] sm:$0x3] %vm22_vm4, %v709_v7 }
   0xd   :  { %182 = vmatprep.mubr.f32.mxu0 %v709_v7  ;;  %v36_v22 = vld [vmem:[%s929_s0 + $0x48] sm:$0xff]  ;;  %v37_v23 = vld [vmem:[%s929_s0 + $0x50] sm:$0xff]  ;;  %v38_v24 = vld [vmem:[%s929_s0 + $0x58] sm:$0xff]  ;;  %26 = vst.msk [vmem:[#allocation4] sm:$0x3] %vm25_vm5, %v709_v7 }
   0xe   :  { %v39_v25 = vld [vmem:[%s929_s0 + $0x60] sm:$0xff]  ;;  %v40_v26 = vld [vmem:[%s929_s0 + $0x68] sm:$0xff]  ;;  %v41_v27 = vld [vmem:[%s929_s0 + $0x70] sm:$0xff]  ;;  %v55_v32 = vsub.s32 0, %v54_v31  ;;  %v59_v34 = vsub.s32 1, %v54_v31 }
   0xf   :  { %v42_v28 = vld [vmem:[%s929_s0 + $0x78] sm:$0xff]  ;;  %v51_v33 = vld [vmem:[%s932_s3] sm:$0x3] }
  0x10   :  { %496 = vmatmul.mubr.msk.f32.gmra.mrb[2].mxu0 %vm63_vm0, %v28_v14  ;;  %v852_v36 = vrot.slane %v51_v33, %v55_v32  ;;  %v854_v38 = vrot.slane %v51_v33, %v59_v34 }
  0x11   :  { %188 = vmatprep.mubr.f32.mxu0 %v709_v7 }
  0x14   :  { %497 = vmatmul.mubr.msk.f32.gmra.mrb[4].mxu0 %vm63_vm0, %v29_v15 }
  0x15   :  { %194 = vmatprep.mubr.f32.mxu0 %v709_v7 }
  0x18   :  { %498 = vmatmul.mubr.msk.f32.gmra.mrb[6].mxu0 %vm63_vm0, %v30_v16 }
  0x19   :  { %200 = vmatprep.mubr.f32.mxu0 %v709_v7 }
  0x1c   :  { %499 = vmatmul.mubr.msk.f32.gmra.mrb[8].mxu0 %vm63_vm0, %v31_v17 }
  0x1d   :  { %206 = vmatprep.mubr.f32.mxu0 %v709_v7 }
  0x20   :  { %500 = vmatmul.mubr.msk.f32.gmra.mrb[10].mxu0 %vm63_vm0, %v32_v18 }
  0x21   :  { %212 = vmatprep.mubr.f32.mxu0 %v709_v7 }
  0x24   :  { %501 = vmatmul.mubr.msk.f32.gmra.mrb[12].mxu0 %vm63_vm0, %v33_v19 }
  0x25   :  { %218 = vmatprep.mubr.f32.mxu0 %v709_v7 }
  0x28   :  { %502 = vmatmul.mubr.msk.f32.gmra.mrb[14].mxu0 %vm63_vm0, %v34_v20 }
  0x29   :  { %224 = vmatprep.mubr.f32.mxu0 %v709_v7 }
  0x2c   :  { %503 = vmatmul.mubr.msk.f32.gmra.mrb[16].mxu0 %vm63_vm0, %v35_v21 }
  0x2d   :  { %230 = vmatprep.mubr.f32.mxu0 %v709_v7 }
  0x30   :  { %504 = vmatmul.mubr.msk.f32.gmra.mrb[18].mxu0 %vm63_vm0, %v36_v22 }
  0x31   :  { %236 = vmatprep.mubr.f32.mxu0 %v709_v7 }
  0x34   :  { %505 = vmatmul.mubr.msk.f32.gmra.mrb[20].mxu0 %vm63_vm0, %v37_v23 }
  0x35   :  { %242 = vmatprep.mubr.f32.mxu0 %v709_v7 }
  0x38   :  { %506 = vmatmul.mubr.msk.f32.gmra.mrb[22].mxu0 %vm63_vm0, %v38_v24 }
  0x39   :  { %248 = vmatprep.mubr.f32.mxu0 %v709_v7 }
  0x3c   :  { %507 = vmatmul.mubr.msk.f32.gmra.mrb[24].mxu0 %vm63_vm0, %v39_v25 }
  0x3d   :  { %254 = vmatprep.mubr.f32.mxu0 %v709_v7 }
  0x40   :  { %508 = vmatmul.mubr.msk.f32.gmra.mrb[26].mxu0 %vm63_vm0, %v40_v26 }
  0x41   :  { %260 = vmatprep.mubr.f32.mxu0 %v709_v7 }
  0x44   :  { %509 = vmatmul.mubr.msk.f32.gmra.mrb[28].mxu0 %vm63_vm0, %v41_v27 }
  0x45   :  { %266 = vmatprep.mubr.f32.mxu0 %v709_v7 }
  0x48   :  { %510 = vmatmul.mubr.msk.f32.gmra.mrb[30].mxu0 %vm63_vm0, %v42_v28 }
  0x49   :  { %612 = vmatprep.mubr.msk.f32.mxu0 %vm711_vm1, %v709_v7 }
  0xdf   :  { %v178_v35 = vpop.f32.mrb[0].mxu0 }
  0xe0   :  { %v180_v37 = vpop.f32.mrb[1].mxu0  ;;  %v179_v40 = vadd.f32 %v178_v35, %v852_v36 }
  0xe1   :  { %v181_v43 = vadd.f32 %v180_v37, %v854_v38 }
  0xe3   :  { %v184_v39 = vpop.f32.mrb[2].mxu0 }
  0xe4   :  { %v185_v41 = vadd.f32 %v184_v39, %v852_v36  ;;  %v186_v42 = vpop.f32.mrb[3].mxu0 }
  0xe5   :  { %v187_v44 = vadd.f32 %v186_v42, %v854_v38 }
  0xe6   :  { %v624_v45 = vpack.c.bf16 %v185_v41, %v179_v40 }
  0xe7   :  { %v648_v46 = vpack.c.bf16 %v187_v44, %v181_v43  ;;  %v190_v47 = vpop.f32.mrb[4].mxu0 }
  0xe8   :  { %v192_v48 = vpop.f32.mrb[5].mxu0  ;;  %625 = vmatpush3.bf16.xpose.msra.mxu1 %v624_v45  ;;  %v191_v50 = vadd.f32 %v190_v47, %v852_v36 }
  0xe9   :  { %649 = vmatpush3.bf16.msra.mxu0 %v648_v46  ;;  %626 = vmatprep.subr.bf16.mxu1 %v710_v29  ;;  %v193_v53 = vadd.f32 %v192_v48, %v854_v38 }
  0xea   :  { %650 = vmatprep.subr.bf16.mxu0 %v710_v29 }
  0xeb   :  { %v196_v49 = vpop.f32.mrb[6].mxu0 }
  0xec   :  { %v197_v51 = vadd.f32 %v196_v49, %v852_v36  ;;  %v198_v52 = vpop.f32.mrb[7].mxu0 }
  0xed   :  { %v199_v54 = vadd.f32 %v198_v52, %v854_v38 }
  0xee   :  { %v627_v55 = vpack.c.bf16 %v197_v51, %v191_v50 }
  0xef   :  { %v651_v56 = vpack.c.bf16 %v199_v54, %v193_v53  ;;  %v202_v57 = vpop.f32.mrb[8].mxu0 }
  0xf0   :  { %v204_v58 = vpop.f32.mrb[9].mxu0  ;;  %628 = vmatpush3.bf16.xpose.msra.mxu1 %v627_v55  ;;  %v203_v60 = vadd.f32 %v202_v57, %v852_v36 }
  0xf1   :  { %652 = vmatpush3.bf16.msra.mxu0 %v651_v56  ;;  %629 = vmatprep.subr.bf16.mxu1 %v710_v29  ;;  %v205_v63 = vadd.f32 %v204_v58, %v854_v38  ;;  %v273_v58 = vld [vmem:[%s930_s1] sm:$0x3]  ;;  %s714_s1 = smov [#allocation4]  }
  0xf2   :  { %653 = vmatprep.subr.bf16.mxu0 %v710_v29  ;;  %s487_s11 = sshll.u32 %s714_s1, 4  ;;  %s488_s11 = int_to_ptr.vmem [resolvable:$true] %s487_s11 }
  0xf3   :  { %v208_v59 = vpop.f32.mrb[10].mxu0  ;;  %s685_s12 = scalar_lea.vmem %s488_s11, 32  ;;  %p690_p1 = scmp.lt.s32.totalorder %s488_s11, %s488_s11 }
  0xf4   :  { %v209_v61 = vadd.f32 %v208_v59, %v852_v36  ;;  %v210_v62 = vpop.f32.mrb[11].mxu0  ;;  %p686_p0 = scmp.ne.s32.totalorder %s488_s11, %s685_s12  ;;  %p691_p2 = scmp.lt.s32.totalorder %s685_s12, %s685_s12 }
  0xf5   :  { %v211_v0 = vadd.f32 %v210_v62, %v854_v38 }
  0xf6   :  { %v630_v1 = vpack.c.bf16 %v209_v61, %v203_v60  ;;  %p692_p3 = por %p691_p2, %p690_p1 }
  0xf7   :  { %v654_v2 = vpack.c.bf16 %v211_v0, %v205_v63  ;;  %v214_v3 = vpop.f32.mrb[12].mxu0  ;;  %v713_v63 = vmov 0  }
  0xf8   :  { %v216_v4 = vpop.f32.mrb[13].mxu0  ;;  %631 = vmatpush3.bf16.xpose.msra.mxu1 %v630_v1  ;;  %v215_v6 = vadd.f32 %v214_v3, %v852_v36  ;;  %677 = vset.pattern.permute.xlu0 %v713_v63  ;;  %p693_p4 = pnand %p692_p3, %p686_p0 }
  0xf9   :  { %655 = vmatpush3.bf16.msra.mxu0 %v654_v2  ;;  %632 = vmatprep.subr.bf16.mxu1 %v710_v29  ;;  %v217_v10 = vadd.f32 %v216_v4, %v854_v38 }
  0xfa   :  { %656 = vmatprep.subr.bf16.mxu0 %v710_v29  ;;  %678 = vset.pattern.permute.xlu1 %v713_v63 }
  0xfb   :  { %v220_v5 = vpop.f32.mrb[14].mxu0 }
  0xfc   :  { %v221_v8 = vadd.f32 %v220_v5, %v852_v36  ;;  %v222_v9 = vpop.f32.mrb[15].mxu0 }
  0xfd   :  { %v223_v11 = vadd.f32 %v222_v9, %v854_v38 }
  0xfe   :  { %v633_v12 = vpack.c.bf16 %v221_v8, %v215_v6 }
  0xff   :  { %v657_v13 = vpack.c.bf16 %v223_v11, %v217_v10  ;;  %v226_v14 = vpop.f32.mrb[16].mxu0  ;;  %v379_v11 = vld [vmem:[#allocation3] sm:$0x3] }
 0x100   :  { %v228_v15 = vpop.f32.mrb[17].mxu0  ;;  %634 = vmatpush3.bf16.xpose.msra.mxu1 %v633_v12  ;;  %v227_v17 = vadd.f32 %v226_v14, %v852_v36 }
 0x101   :  { %658 = vmatpush3.bf16.msra.mxu0 %v657_v13  ;;  %635 = vmatprep.subr.bf16.mxu1 %v710_v29  ;;  %v229_v20 = vadd.f32 %v228_v15, %v854_v38 }
 0x102   :  { %659 = vmatprep.subr.bf16.mxu0 %v710_v29 }
 0x103   :  { %v232_v16 = vpop.f32.mrb[18].mxu0 }
 0x104   :  { %v233_v18 = vadd.f32 %v232_v16, %v852_v36  ;;  %v234_v19 = vpop.f32.mrb[19].mxu0  ;;  %v387_v16 = vld [vmem:[#allocation4] sm:$0x3] }
 0x105   :  { %v235_v21 = vadd.f32 %v234_v19, %v854_v38 }
 0x106   :  { %v636_v22 = vpack.c.bf16 %v233_v18, %v227_v17 }
 0x107   :  { %v660_v23 = vpack.c.bf16 %v235_v21, %v229_v20  ;;  %v238_v24 = vpop.f32.mrb[20].mxu0 }
 0x108   :  { %v240_v25 = vpop.f32.mrb[21].mxu0  ;;  %637 = vmatpush3.bf16.xpose.msra.mxu1 %v636_v22  ;;  %v239_v27 = vadd.f32 %v238_v24, %v852_v36 }
 0x109   :  { %661 = vmatpush3.bf16.msra.mxu0 %v660_v23  ;;  %638 = vmatprep.subr.bf16.mxu1 %v710_v29  ;;  %v241_v32 = vadd.f32 %v240_v25, %v854_v38 }
 0x10a   :  { %662 = vmatprep.subr.bf16.mxu0 %v710_v29 }
 0x10b   :  { %v244_v26 = vpop.f32.mrb[22].mxu0 }
 0x10c   :  { %v245_v28 = vadd.f32 %v244_v26, %v852_v36  ;;  %v246_v31 = vpop.f32.mrb[23].mxu0 }
 0x10d   :  { %v247_v33 = vadd.f32 %v246_v31, %v854_v38 }
 0x10e   :  { %v639_v34 = vpack.c.bf16 %v245_v28, %v239_v27 }
 0x10f   :  { %v663_v35 = vpack.c.bf16 %v247_v33, %v241_v32  ;;  %v250_v37 = vpop.f32.mrb[24].mxu0 }
 0x110   :  { %v252_v39 = vpop.f32.mrb[25].mxu0  ;;  %640 = vmatpush3.bf16.xpose.msra.mxu1 %v639_v34  ;;  %v251_v41 = vadd.f32 %v250_v37, %v852_v36 }
 0x111   :  { %664 = vmatpush3.bf16.msra.mxu0 %v663_v35  ;;  %641 = vmatprep.subr.bf16.mxu1 %v710_v29  ;;  %v253_v44 = vadd.f32 %v252_v39, %v854_v38 }
 0x112   :  { %665 = vmatprep.subr.bf16.mxu0 %v710_v29 }
 0x113   :  { %v256_v40 = vpop.f32.mrb[26].mxu0 }
 0x114   :  { %v257_v42 = vadd.f32 %v256_v40, %v852_v36  ;;  %v258_v43 = vpop.f32.mrb[27].mxu0 }
 0x115   :  { %v259_v45 = vadd.f32 %v258_v43, %v854_v38 }
 0x116   :  { %v642_v46 = vpack.c.bf16 %v257_v42, %v251_v41 }
 0x117   :  { %v666_v47 = vpack.c.bf16 %v259_v45, %v253_v44  ;;  %v262_v48 = vpop.f32.mrb[28].mxu0 }
 0x118   :  { %v264_v49 = vpop.f32.mrb[29].mxu0  ;;  %643 = vmatpush3.bf16.xpose.msra.mxu1 %v642_v46  ;;  %v263_v51 = vadd.f32 %v262_v48, %v852_v36 }
 0x119   :  { %667 = vmatpush3.bf16.msra.mxu0 %v666_v47  ;;  %644 = vmatprep.subr.bf16.mxu1 %v710_v29  ;;  %v265_v54 = vadd.f32 %v264_v49, %v854_v38 }
 0x11a   :  { %668 = vmatprep.subr.bf16.mxu0 %v710_v29  ;;  %v350_v29 = vand.u32 127, %v53_v30 }
 0x11b   :  { %v268_v50 = vpop.f32.mrb[30].mxu0 }
 0x11c   :  { %v269_v52 = vadd.f32 %v268_v50, %v852_v36  ;;  %v270_v53 = vpop.f32.mrb[31].mxu0  ;;  %vm353_vm2 = vcmp.lt.s32.totalorder %v350_v29, 8 }
 0x11d   :  { %v271_v55 = vadd.f32 %v270_v53, %v854_v38  ;;  %v712_v38 = vmov -inf  }
 0x11e   :  { %v645_v56 = vpack.c.bf16 %v269_v52, %v263_v51  ;;  %23 = vst.msk [vmem:[#allocation2] sm:$0x3] %vm22_vm4, %v712_v38 }
 0x11f   :  { %v669_v57 = vpack.c.bf16 %v271_v55, %v265_v54 }
 0x120   :  { %646 = vmatpush3.bf16.xpose.msra.mxu1 %v645_v56 }
 0x121   :  { %670 = vmatpush3.bf16.msra.mxu0 %v669_v57 }
 0x125   :  { %v362_v30 = vld [vmem:[#allocation2] sm:$0x3] }
 0x127   :  { %578 = vmatmul.mubr.f32.vlgmr.msra.gmra.mrb[0].mxu1 %v273_v58 }
 0x1fa   :  { %v340_v59 = vpop.f32.mrb[0].mxu1 }
 0x1fb   :  { %v344_v60 = vmul.f32 0.088388346, %v340_v59  ;;  %v579_v36 = vpop.f32.mrb[1].mxu1 }
 0x1fd   :  { %v356_v61 = vsel %vm353_vm2, %v344_v60, -inf }
 0x1fe   :  { %v364_v62 = vsel %vm363_vm3, %v356_v61, -inf }
 0x1ff   :  { %365 = vmax.xlane.f32.xlu0 %v364_v62 }
 0x28c   :  { %v366_v0 = vpop.xlane.xlu0 %365 }
 0x28d   :  { %v367_v1 = vmax.f32 %v362_v30, %v366_v0 }
 0x28f   :  { %v368_v2 = vsub.f32 %v362_v30, %v367_v1  ;;  %467 = vst.msk [vmem:[#allocation2] sm:$0x3] %vm22_vm4, %v367_v1  ;;  %373 = vperm.xlu0 %677, %v367_v1  }
 0x291   :  { %v369_v9 = vmul.f32 1.442695, %v368_v2 }
 0x30e   :  { %v374_v3 = vpop.permute.xlu0 %373 }
 0x30f   :  { %v376_v4 = vsub.f32 %v356_v61, %v374_v3 }
 0x311   :  { %v377_v5 = vmul.f32 1.442695, %v376_v4 }
 0x313   :  { %679 = vpow2.f32 %v377_v5 }
 0x314   :  { %681 = vpow2.f32 %v369_v9 }
 0x31d   :  { %v680_v6 = vpop.eup %679 }
 0x31e   :  { %613 = vmatmul.mubr.f32.vlgmr.msra.gmra.mrb[32].mxu0 %v680_v6  ;;  %v381_v8 = vsel %vm363_vm3, %v680_v6, 0.0  ;;  %v682_v10 = vpop.eup %681 }
 0x31f   :  { %382 = vadd.xlane.f32.xlu1 %v381_v8  ;;  %v380_v12 = vmul.f32 %v682_v10, %v379_v11 }
 0x330   :  { %390 = vperm.xlu1 %678, %v682_v10  }
 0x3ac   :  { %v383_v13 = vpop.xlane.xlu1 %382 }
 0x3ad   :  { %v384_v14 = vadd.f32 %v383_v13, %v380_v12 }
 0x3af   :  { %386 = vst.msk [vmem:[#allocation3] sm:$0x3] %vm22_vm4, %v384_v14 }
 0x3b0   :  { %v391_v17 = vpop.permute.xlu1 %390 }
 0x3b1   :  { %v393_v18 = vmul.f32 %v391_v17, %v387_v16 }
 0x3b6   :  { %v472_v15 = vld [vmem:[#allocation3] sm:$0x3] }
 0x3b7   :  { %475 = vperm.xlu1 %678, %v472_v15  }
 0x3f1   :  { %v460_v19 = vpop.f32.mrb[32].mxu0 }
 0x3f2   :  { %v464_v20 = vadd.f32 %v460_v19, %v393_v18  ;;  %v614_v21 = vpop.f32.mrb[33].mxu0 }
 0x3f4   :  { %466 = vst.msk [vmem:[#allocation4] sm:$0x3] %vm25_vm5, %v464_v20 }
 0x3fb   :  { %v471_v23 = vld [vmem:[#allocation4] sm:$0x3] }
 0x436   :  { %v476_v22 = vpop.permute.xlu1 %475 }
 0x437   :  { %683 = vrcp.f32 %v476_v22 }
 0x441   :  { %v684_v7 = vpop.eup %683 }
 0x442   :  { %v479_v24 = vmul.f32 %v684_v7, %v471_v23 }
 0x444   :  { %480 = vst.msk [vmem:[#allocation4] sm:$0x3] %vm25_vm5, %v479_v24 }
 0x445   :  { %696 = shalt.err (!%p693_p4)
}
 0x446   :  { %s697_s15 = scalar_lea.hbm %s933_s4, 32 }
 0x447   :  { %p698_p5 = scmp.ne.s32.totalorder %s933_s4, %s697_s15  ;;  %p701_p6 = scmp.lt.u32.totalorder %s697_s15, %s933_s4 }
 0x449   :  { %p703_p7 = pnand %p701_p6, %p698_p5 }
 0x44b   :  { %706 = shalt.err (!%p703_p7)
}
 0x44c   :  { %490 = dma.vmem_to_hbm [thread:$0]  %s488_s11, 32, %s933_s4, [#allocation5]  }
 0x44d   :  { %707 = dma.done.wait [#allocation5], 32  }
 0x44e   :  { %708 = vsyncadd [#allocation5], 4294967264 }
 0x44f   :  { %494 = vsyncpa [#allocation5], 1 }

</bundles_post_ra>
